<compile_context>
chip_gen: v7x
topology: tpu7x:2x2x1
jax: 0.10.0
libtpu: 0.0.40
codegen_flags: <defaults>
</compile_context>

<pallas_src>
import functools

import jax
import jax.numpy as jnp
from jax.experimental import pallas as pl
from jax.experimental.pallas import tpu as pltpu


def _round_up(n, m):
    return ((n + m - 1) // m) * m


def _sublane(dtype):
    # rows per packed sublane: f32 -> 8, bf16 -> 16, int8/fp8 -> 32
    return max(8, 32 // jnp.dtype(dtype).itemsize)


def _pick_tk(d_ff, tk_cap):
    """Largest multiple-of-128 divisor of d_ff that is <= tk_cap.  Falls back to
    the full d_ff only when d_ff itself is not 128-aligned (block must then equal
    the full dim to satisfy the (8,128) constraint)."""
    if d_ff % 128 != 0:
        return d_ff
    t = min(_round_up(max(tk_cap, 128), 128), d_ff)
    t = (t // 128) * 128
    while t >= 128:
        if d_ff % t == 0:
            return t
        t -= 128
    return d_ff


def _ffn_kernel_acc(x_ref, wi_t_ref, wo_t_ref, o_ref, acc_ref):
    """General variant: f32 accumulator scratch, single cast at the end.
    x_ref:(tm,d_model)  wi_t_ref:(d_model,tk)  wo_t_ref:(tk,d_model)  o_ref:(tm,d_model)"""
    k = pl.program_id(1)

    @pl.when(k == 0)
    def _init():
        acc_ref[...] = jnp.zeros_like(acc_ref)

    # wi: hidden chunk = x @ wi_t_chunk (MXU, f32 accumulate)
    h = jnp.dot(x_ref[...], wi_t_ref[...], preferred_element_type=jnp.float32)
    # act: ReLU (UdopConfig default dense_act_fn == "relu")
    h = jnp.maximum(h, 0.0)
    # dropout: identity in eval mode; cast to wo weight dtype as in the module
    h = h.astype(wo_t_ref.dtype)
    # wo: accumulate partial output over d_ff chunks
    acc_ref[...] += jnp.dot(h, wo_t_ref[...], preferred_element_type=jnp.float32)

    @pl.when(k == pl.num_programs(1) - 1)
    def _finish():
        o_ref[...] = acc_ref[...].astype(o_ref.dtype)


def _ffn_kernel_f32out(x_ref, wi_t_ref, wo_t_ref, o_ref):
    """float32-output variant: accumulate directly into the resident output block
    (saves the tm*d_model*4 B scratch and the final copy)."""
    k = pl.program_id(1)

    @pl.when(k == 0)
    def _init():
        o_ref[...] = jnp.zeros_like(o_ref)

    h = jnp.dot(x_ref[...], wi_t_ref[...], preferred_element_type=jnp.float32)
    h = jnp.maximum(h, 0.0)
    h = h.astype(wo_t_ref.dtype)
    o_ref[...] += jnp.dot(h, wo_t_ref[...], preferred_element_type=jnp.float32)


@functools.partial(jax.jit, static_argnames=("tm", "tk_ff"))
def udop_dense_act_dense(hidden_states, wi_t, wo_t, *, tm=1024, tk_ff=512):
    """T5-style FFN  wo(relu(wi(x)))  with eval-mode (identity) dropout.

    hidden_states: (..., d_model)
    wi_t:          (d_model, d_ff)   pre-transposed nn.Linear weight
    wo_t:          (d_ff,  d_model)  pre-transposed nn.Linear weight
    """
    orig_shape = hidden_states.shape
    d_model = orig_shape[-1]
    d_ff = wi_t.shape[1]
    M = 1
    for s in orig_shape[:-1]:
        M *= s

    out_dtype = hidden_states.dtype
    w_dtype = wi_t.dtype
    w_isize = jnp.dtype(w_dtype).itemsize
    o_isize = jnp.dtype(out_dtype).itemsize
    use_scratch = out_dtype != jnp.float32

    x = hidden_states.reshape(M, d_model)
    if x.dtype != w_dtype:
        x = x.astype(w_dtype)  # bf16 activations when weights are bf16

    # ---- d_ff reduction tile -------------------------------------------------
    tk_eff = _pick_tk(d_ff, tk_ff)
    n_k = d_ff // tk_eff

    # ---- row tile: minimize padding; >=2 tiles for v7x megacore when M is big
    sub = _sublane(w_dtype)
    n_target = max(pl.cdiv(M, tm), 2 if M >= 512 else 1)
    tm_eff = min(_round_up(pl.cdiv(M, n_target), sub), _round_up(M, sub))

    # ---- VMEM budget: query chip, keep headroom, shrink tiles if needed ------
    def _footprint(tm_):
        b = 2 * tm_ * d_model * w_isize          # x tile (double buffered)
        b += 2 * d_model * tk_eff * w_isize      # wi_t chunk (double buffered)
        b += 2 * tk_eff * d_model * w_isize      # wo_t chunk (double buffered)
        b += 2 * tm_ * d_model * o_isize         # out tile (double buffered)
        b += tm_ * tk_eff * 4                    # intermediate h (f32)
        if use_scratch:
            b += tm_ * d_model * 4               # f32 accumulator scratch
        return b

    try:
        vmem_cap = int(pltpu.get_tpu_info().vmem_capacity_bytes)
    except Exception:
        vmem_cap = 64 * 1024 * 1024              # v7x-safe lower bound
    budget = int(0.85 * vmem_cap)                # headroom for compiler scratch

    while _footprint(tm_eff) > budget and tm_eff > sub:
        tm_eff = _round_up(max(sub, tm_eff // 2), sub)

    if tm_eff >= M:
        tm_eff = M                               # single block == full dim (legal)
    n_row_tiles = pl.cdiv(M, tm_eff)

    vmem_limit = int(min(budget, max(32 * 1024 * 1024, 2 * _footprint(tm_eff))))

    # ---- cost estimate: weights are re-streamed once per row tile ------------
    weight_bytes = (wi_t.size + wo_t.size) * w_isize
    cost = pl.CostEstimate(
        flops=4 * M * d_model * d_ff,
        transcendentals=0,
        bytes_accessed=M * d_model * (w_isize + o_isize) + n_row_tiles * weight_bytes,
    )

    if use_scratch:
        kernel = _ffn_kernel_acc
        scratch_shapes = [pltpu.VMEM((tm_eff, d_model), jnp.float32)]
    else:
        kernel = _ffn_kernel_f32out
        scratch_shapes = []

    out = pl.pallas_call(
        kernel,
        out_shape=jax.ShapeDtypeStruct((M, d_model), out_dtype),
        grid_spec=pltpu.PrefetchScalarGridSpec(
            num_scalar_prefetch=0,
            grid=(n_row_tiles, n_k),             # (parallel rows, arbitrary d_ff)
            in_specs=[
                pl.BlockSpec((tm_eff, d_model), lambda i, k: (i, 0)),
                pl.BlockSpec((d_model, tk_eff), lambda i, k: (0, k)),
                pl.BlockSpec((tk_eff, d_model), lambda i, k: (k, 0)),
            ],
            out_specs=pl.BlockSpec((tm_eff, d_model), lambda i, k: (i, 0)),
            scratch_shapes=scratch_shapes,
        ),
        compiler_params=pltpu.CompilerParams(
            dimension_semantics=("parallel", "arbitrary"),
            vmem_limit_bytes=vmem_limit,
        ),
        cost_estimate=cost,
    )(x, wi_t, wo_t)

    return out.reshape(orig_shape)


def prepare_udop_ffn_params(wi_weight, wo_weight, dtype=jnp.bfloat16):
    """One-time (outside jit) conversion from PyTorch nn.Linear layout:
       wi_weight (d_ff, d_model) -> wi_t (d_model, d_ff)
       wo_weight (d_model, d_ff) -> wo_t (d_ff, d_model)
    Defaults to bf16: halves weight HBM/VMEM bytes and uses the native bf16 MXU
    path on all TPU generations.  Pass dtype=jnp.float32 for the exact path."""
    wi_t = jnp.asarray(wi_weight).T
    wo_t = jnp.asarray(wo_weight).T
    if dtype is not None:
        wi_t = wi_t.astype(dtype)
        wo_t = wo_t.astype(dtype)
    return jax.block_until_ready(wi_t), jax.block_until_ready(wo_t)


def _reference(hidden_states, wi_weight, wo_weight):
    h = hidden_states @ wi_weight.T
    h = jnp.maximum(h, 0.0)
    return h @ wo_weight.T


if __name__ == "__main__":
    # small synthetic config: d_model=128, d_ff=256, batch=2, seq=8
    B, S, d_model, d_ff = 2, 8, 128, 256

    key = jax.random.PRNGKey(0)
    k_x, k_wi, k_wo = jax.random.split(key, 3)

    hidden_states = jax.random.normal(k_x, (B, S, d_model), dtype=jnp.float32)
    # deterministic params (PyTorch nn.Linear(d_model, d_ff, bias=False) layouts)
    wi_weight = jax.random.normal(k_wi, (d_ff, d_model), dtype=jnp.float32) * 0.02
    wo_weight = jax.random.normal(k_wo, (d_model, d_ff), dtype=jnp.float32) * 0.02

    ref = _reference(hidden_states, wi_weight, wo_weight)

    # --- path A: f32 weights / f32 activations (direct-output kernel, exact) ---
    wi_t32, wo_t32 = prepare_udop_ffn_params(wi_weight, wo_weight, dtype=jnp.float32)
    out32 = jax.block_until_ready(udop_dense_act_dense(hidden_states, wi_t32, wo_t32))
    assert out32.shape == (B, S, d_model)
    assert jnp.allclose(out32, ref, atol=2e-3, rtol=2e-3), "f32 mismatch vs reference"

    # --- path B: default bf16 weights + bf16 activations, 2 d_ff chunks --------
    wi_t16, wo_t16 = prepare_udop_ffn_params(wi_weight, wo_weight)  # bf16 default
    out16 = jax.block_until_ready(
        udop_dense_act_dense(hidden_states.astype(jnp.bfloat16), wi_t16, wo_t16, tk_ff=128)
    )
    assert out16.shape == (B, S, d_model)
    assert jnp.allclose(out16.astype(jnp.float32), ref, atol=1e-2, rtol=5e-2), \
        "bf16 mismatch vs reference"

    print("KERNEL_OK")
</pallas_src>

<mosaic_0001>
module attributes {stable_mosaic.version = 11 : i64} {
  func.func @_ffn_kernel_f32out(%arg0: i32, %arg1: i32, %arg2: memref<16x128xf32, #tpu.memory_space<vmem>>, %arg3: memref<128x256xf32, #tpu.memory_space<vmem>>, %arg4: memref<256x128xf32, #tpu.memory_space<vmem>>, %arg5: memref<16x128xf32, #tpu.memory_space<vmem>>) attributes {dimension_semantics = [#tpu.dimension_semantics<parallel>, #tpu.dimension_semantics<arbitrary>], iteration_bounds = array<i64: 1, 1>, scalar_prefetch = 0 : i64, scratch_operands = 0 : i64, tpu.core_type = #tpu.core_type<tc>, window_params = [{transform_indices = @transform_0, window_bounds = array<i64: 16, 128>}, {transform_indices = @transform_1, window_bounds = array<i64: 128, 256>}, {transform_indices = @transform_2, window_bounds = array<i64: 256, 128>}, {transform_indices = @transform_3, window_bounds = array<i64: 16, 128>}]} {
    %c0_i32 = arith.constant 0 : i32
    %0 = arith.cmpi eq, %arg1, %c0_i32 : i32
    %1 = arith.extui %0 : i1 to i32
    %c0_i32_0 = arith.constant 0 : i32
    %2 = arith.cmpi ne, %1, %c0_i32_0 : i32
    scf.if %2 {
      %cst_12 = arith.constant 0.000000e+00 : f32
      %13 = vector.broadcast %cst_12 : f32 to vector<16x128xf32>
      %c0_13 = arith.constant 0 : index
      %c0_14 = arith.constant 0 : index
      %14 = vector.load %arg5[%c0_13, %c0_14] : memref<16x128xf32, #tpu.memory_space<vmem>>, vector<16x128xf32>
      tpu.vector_store %arg5[%c0_13, %c0_14], %13 {strides = array<i32>} : memref<16x128xf32, #tpu.memory_space<vmem>>, vector<16x128xf32>,
    } else {
    }
    %c0 = arith.constant 0 : index
    %c0_1 = arith.constant 0 : index
    %3 = vector.load %arg2[%c0, %c0_1] : memref<16x128xf32, #tpu.memory_space<vmem>>, vector<16x128xf32>
    %c0_2 = arith.constant 0 : index
    %c0_3 = arith.constant 0 : index
    %4 = vector.load %arg3[%c0_2, %c0_3] : memref<128x256xf32, #tpu.memory_space<vmem>>, vector<128x256xf32>
    %cst = arith.constant dense<0.000000e+00> : vector<16x256xf32>
    %5 = tpu.matmul %3, %4, %cst {dimension_numbers = #tpu.dot_dimension_numbers<[1], [0], [0], [1], [0, 0, 1, 1], [], []>} : vector<16x128xf32>, vector<128x256xf32>, vector<16x256xf32> -> vector<16x256xf32>
    %cst_4 = arith.constant 0.000000e+00 : f32
    %6 = vector.broadcast %cst_4 : f32 to vector<16x256xf32>
    %7 = arith.maximumf %5, %6 : vector<16x256xf32>
    %c0_5 = arith.constant 0 : index
    %c0_6 = arith.constant 0 : index
    %8 = vector.load %arg5[%c0_5, %c0_6] : memref<16x128xf32, #tpu.memory_space<vmem>>, vector<16x128xf32>
    %c0_7 = arith.constant 0 : index
    %c0_8 = arith.constant 0 : index
    %9 = vector.load %arg4[%c0_7, %c0_8] : memref<256x128xf32, #tpu.memory_space<vmem>>, vector<256x128xf32>
    %cst_9 = arith.constant dense<0.000000e+00> : vector<16x128xf32>
    %10 = tpu.matmul %7, %9, %cst_9 {dimension_numbers = #tpu.dot_dimension_numbers<[1], [0], [0], [1], [0, 0, 1, 1], [], []>} : vector<16x256xf32>, vector<256x128xf32>, vector<16x128xf32> -> vector<16x128xf32>
    %11 = arith.addf %8, %10 : vector<16x128xf32>
    %c0_10 = arith.constant 0 : index
    %c0_11 = arith.constant 0 : index
    %12 = vector.load %arg5[%c0_10, %c0_11] : memref<16x128xf32, #tpu.memory_space<vmem>>, vector<16x128xf32>
    tpu.vector_store %arg5[%c0_10, %c0_11], %11 {strides = array<i32>} : memref<16x128xf32, #tpu.memory_space<vmem>>, vector<16x128xf32>,
    return
  }
  func.func @transform_0(%arg0: i32, %arg1: i32) -> (i32, i32) {
    %c0_i32 = arith.constant 0 : i32
    %c0_i32_0 = arith.constant 0 : i32
    return %arg0, %c0_i32 : i32, i32
  }
  func.func @transform_1(%arg0: i32, %arg1: i32) -> (i32, i32) {
    %c0_i32 = arith.constant 0 : i32
    %c0_i32_0 = arith.constant 0 : i32
    return %c0_i32, %arg1 : i32, i32
  }
  func.func @transform_2(%arg0: i32, %arg1: i32) -> (i32, i32) {
    %c0_i32 = arith.constant 0 : i32
    %c0_i32_0 = arith.constant 0 : i32
    return %arg1, %c0_i32 : i32, i32
  }
  func.func @transform_3(%arg0: i32, %arg1: i32) -> (i32, i32) {
    %c0_i32 = arith.constant 0 : i32
    %c0_i32_0 = arith.constant 0 : i32
    return %arg0, %c0_i32 : i32, i32
  }
}

</mosaic_0001>

<bundles_post_ra>
// kernel: udop_dense_act_dense.1
= control target key start
LH: loop header
LB: loop body
LE: loop exit
PB: predicated region body
PF: predicated region fallthrough
CT: control target
= control target key end

     0   :  { %8 = vsyncpa [#allocation3], 0  ;;  %s601_s0 = inlined_call_operand.hbm [shape: f32[16,128], index: 0, kind: input, shape index: {}]   ;;  %s602_s1 = inlined_call_operand.hbm [shape: f32[128,256], index: 1, kind: input, shape index: {}]   ;;  %s603_s2 = inlined_call_operand.hbm [shape: f32[256,128], index: 2, kind: input, shape index: {}]   ;;  %s604_s3 = inlined_call_operand.hbm [shape: f32[16,128], index: 3, kind: output, shape index: {}]  }
   0x1   :  { %9 = vsyncpa [#allocation6], 0 }
   0x2   :  { %10 = vsyncpa [#allocation4], 0  ;;  %s513_s12 = smov [#allocation5]   ;;  %s419_s16 = scalar_lea.hbm %s602_s1, 4096 }
   0x3   :  { %s28_s13 = sshll.u32 %s513_s12, 4  ;;  %p420_p0 = scmp.ne.s32.totalorder %s602_s1, %s419_s16  ;;  %s29_s13 = int_to_ptr.vmem [resolvable:$true] %s28_s13 }
   0x4   :  { %p423_p1 = scmp.lt.u32.totalorder %s419_s16, %s602_s1 }
   0x6   :  { %p425_p2 = pnand %p423_p1, %p420_p0 }
   0x8   :  { %428 = shalt.err (!%p425_p2)
}
   0x9   :  { %s429_s21 = scalar_lea.vmem %s29_s13, 4096  ;;  %p434_p4 = scmp.lt.s32.totalorder %s29_s13, %s29_s13 }
   0xa   :  { %p430_p3 = scmp.ne.s32.totalorder %s29_s13, %s429_s21  ;;  %p435_p5 = scmp.lt.s32.totalorder %s429_s21, %s429_s21 }
   0xc   :  { %p436_p6 = por %p435_p5, %p434_p4 }
   0xe   :  { %p437_p7 = pnand %p436_p6, %p430_p3 }
  0x10   :  { %440 = shalt.err (!%p437_p7)
}
  0x11   :  { %s514_s22 = smov 256   ;;  %s515_s23 = smov 16  }
  0x12   :  { %34 = dma.hbm_to_vmem [thread:$0]  %s602_s1, 4096, %s29_s13, [#allocation6], %s514_s22, %s514_s22, %s515_s23  }
  0x13   :  { %s516_s26 = smov [#allocation2]   ;;  %s441_s30 = scalar_lea.hbm %s601_s0, 256 }
  0x14   :  { %s16_s27 = sshll.u32 %s516_s26, 4  ;;  %p442_p8 = scmp.ne.s32.totalorder %s601_s0, %s441_s30  ;;  %s17_s27 = int_to_ptr.vmem [resolvable:$true] %s16_s27 }
  0x15   :  { %p445_p9 = scmp.lt.u32.totalorder %s441_s30, %s601_s0 }
  0x17   :  { %p447_p10 = pnand %p445_p9, %p442_p8 }
  0x19   :  { %450 = shalt.err (!%p447_p10)
}
  0x1a   :  { %s451_s8 = scalar_lea.vmem %s17_s27, 256  ;;  %p456_p12 = scmp.lt.s32.totalorder %s17_s27, %s17_s27 }
  0x1b   :  { %p452_p11 = scmp.ne.s32.totalorder %s17_s27, %s451_s8  ;;  %p457_p13 = scmp.lt.s32.totalorder %s451_s8, %s451_s8 }
  0x1d   :  { %p458_p0 = por %p457_p13, %p456_p12 }
  0x1f   :  { %p459_p1 = pnand %p458_p0, %p452_p11 }
  0x21   :  { %462 = shalt.err (!%p459_p1)
}
  0x22   :  { %s517_s1 = smov 128   ;;  %s518_s9 = smov 8  }
  0x23   :  { %22 = dma.hbm_to_vmem [thread:$0]  %s601_s0, 256, %s17_s27, [#allocation3], %s517_s1, %s517_s1, %s518_s9  }
  0x24   :  { %s519_s12 = smov [#allocation7]   ;;  %s463_s16 = scalar_lea.hbm %s603_s2, 4096 }
  0x25   :  { %s40_s13 = sshll.u32 %s519_s12, 4  ;;  %p464_p2 = scmp.ne.s32.totalorder %s603_s2, %s463_s16  ;;  %s41_s13 = int_to_ptr.vmem [resolvable:$true] %s40_s13 }
  0x26   :  { %p467_p3 = scmp.lt.u32.totalorder %s463_s16, %s603_s2 }
  0x28   :  { %p469_p4 = pnand %p467_p3, %p464_p2 }
  0x2a   :  { %472 = shalt.err (!%p469_p4)
}
  0x2b   :  { %s473_s21 = scalar_lea.vmem %s41_s13, 4096  ;;  %p478_p6 = scmp.lt.s32.totalorder %s41_s13, %s41_s13 }
  0x2c   :  { %p474_p5 = scmp.ne.s32.totalorder %s41_s13, %s473_s21  ;;  %p479_p7 = scmp.lt.s32.totalorder %s473_s21, %s473_s21 }
  0x2e   :  { %p480_p8 = por %p479_p7, %p478_p6 }
  0x30   :  { %p481_p9 = pnand %p480_p8, %p474_p5 }
  0x32   :  { %484 = shalt.err (!%p481_p9)
}
  0x33   :  { %46 = dma.hbm_to_vmem [thread:$0]  %s603_s2, 4096, %s41_s13, [#allocation6], %s517_s1, %s517_s1, %s518_s9  }
  0x34   :  { %507 = dma.done.wait [#allocation3], 256  }
  0x35   :  { %508 = vsyncadd [#allocation3], 4294967040 }
  0x36   :  { %509 = dma.done.wait [#allocation6], 8192  }
  0x37   :  { %510 = vsyncadd [#allocation6], 4294959104  ;;  %v520_v0 = vmov 0.0   ;;  %v65_v1 = vld [vmem:[#allocation5 + $0x8] sm:$0xff]  ;;  %v67_v2 = vld [vmem:[#allocation5 + $0x18] sm:$0xff]  ;;  %s521_s2 = smov [#allocation8]  }
  0x38   :  { %160 = vmatprep.mubr.f32.mxu0 %v520_v0  ;;  %v64_v3 = vld [vmem:[#allocation5] sm:$0xff]  ;;  %v346_v4 = vpack.c.bf16 %v67_v2, %v65_v1  ;;  %v66_v5 = vld [vmem:[#allocation5 + $0x10] sm:$0xff]  ;;  %v69_v6 = vld [vmem:[#allocation5 + $0x28] sm:$0xff]  ;;  %s295_s23 = sshll.u32 %s521_s2, 4  ;;  %s296_s23 = int_to_ptr.vmem [resolvable:$true] %s295_s23 }
  0x39   :  { %v71_v7 = vld [vmem:[#allocation5 + $0x38] sm:$0xff]  ;;  %v348_v8 = vpack.c.bf16 %v66_v5, %v64_v3  ;;  %v68_v10 = vld [vmem:[#allocation5 + $0x20] sm:$0xff]  ;;  %v70_v11 = vld [vmem:[#allocation5 + $0x30] sm:$0xff]  ;;  %s485_s24 = scalar_lea.vmem %s296_s23, 256  ;;  %p490_p11 = scmp.lt.s32.totalorder %s296_s23, %s296_s23 }
  0x3a   :  { %v350_v9 = vpack.c.bf16 %v71_v7, %v69_v6  ;;  %v73_v12 = vld [vmem:[#allocation5 + $0x48] sm:$0xff]  ;;  %347 = vmatprep.subr.bf16.mxu0 %v346_v4  ;;  %v75_v13 = vld [vmem:[#allocation5 + $0x58] sm:$0xff]  ;;  %v352_v14 = vpack.c.bf16 %v70_v11, %v68_v10  ;;  %v72_v16 = vld [vmem:[#allocation5 + $0x40] sm:$0xff]  ;;  %p486_p10 = scmp.ne.s32.totalorder %s296_s23, %s485_s24  ;;  %p491_p12 = scmp.lt.s32.totalorder %s485_s24, %s485_s24 }
  0x3b   :  { %349 = vmatpush1.bf16.msra.mxu0 %v348_v8  ;;  %v354_v15 = vpack.c.bf16 %v75_v13, %v73_v12  ;;  %v74_v17 = vld [vmem:[#allocation5 + $0x50] sm:$0xff]  ;;  %v77_v18 = vld [vmem:[#allocation5 + $0x68] sm:$0xff]  ;;  %v79_v19 = vld [vmem:[#allocation5 + $0x78] sm:$0xff] }
  0x3c   :  { %351 = vmatprep.subr.bf16.mxu0 %v350_v9  ;;  %v356_v20 = vpack.c.bf16 %v74_v17, %v72_v16  ;;  %v358_v21 = vpack.c.bf16 %v79_v19, %v77_v18  ;;  %v76_v22 = vld [vmem:[#allocation5 + $0x60] sm:$0xff]  ;;  %v78_v23 = vld [vmem:[#allocation5 + $0x70] sm:$0xff]  ;;  %v81_v24 = vld [vmem:[#allocation5 + $0x88] sm:$0xff]  ;;  %p492_p13 = por %p491_p12, %p490_p11 }
  0x3d   :  { %v83_v25 = vld [vmem:[#allocation5 + $0x98] sm:$0xff]  ;;  %v80_v26 = vld [vmem:[#allocation5 + $0x80] sm:$0xff]  ;;  %v82_v27 = vld [vmem:[#allocation5 + $0x90] sm:$0xff]  ;;  %v360_v30 = vpack.c.bf16 %v78_v23, %v76_v22 }
  0x3e   :  { %v195_v28 = vld [vmem:[#allocation7 + $0x80] sm:$0xff]  ;;  %v196_v29 = vld [vmem:[#allocation7 + $0x88] sm:$0xff]  ;;  %v197_v35 = vld [vmem:[#allocation7 + $0x90] sm:$0xff]  ;;  %v362_v36 = vpack.c.bf16 %v83_v25, %v81_v24  ;;  %v364_v46 = vpack.c.bf16 %v82_v27, %v80_v26  ;;  %p493_p0 = pnand %p492_p13, %p486_p10 }
  0x3f   :  { %353 = vmatpush1.bf16.msra.mxu0 %v352_v14  ;;  %v85_v31 = vld [vmem:[#allocation5 + $0xa8] sm:$0xff]  ;;  %v378_v32 = vpack.c.bf16 %v196_v29, %v195_v28  ;;  %v179_v33 = vld [vmem:[#allocation7] sm:$0xff]  ;;  %v198_v38 = vld [vmem:[#allocation7 + $0x98] sm:$0xff] }
  0x40   :  { %355 = vmatprep.subr.bf16.mxu0 %v354_v15  ;;  %v180_v34 = vld [vmem:[#allocation7 + $0x8] sm:$0xff]  ;;  %v181_v39 = vld [vmem:[#allocation7 + $0x10] sm:$0xff]  ;;  %v182_v40 = vld [vmem:[#allocation7 + $0x18] sm:$0xff]  ;;  %v382_v42 = vpack.c.bf16 %v198_v38, %v197_v35 }
  0x41   :  { %v380_v37 = vpack.c.bf16 %v180_v34, %v179_v33  ;;  %v87_v41 = vld [vmem:[#allocation5 + $0xb8] sm:$0xff]  ;;  %379 = vmatprep.subr.bf16.mxu1 %v378_v32  ;;  %v199_v43 = vld [vmem:[#allocation7 + $0xa0] sm:$0xff]  ;;  %v200_v44 = vld [vmem:[#allocation7 + $0xa8] sm:$0xff]  ;;  %v384_v45 = vpack.c.bf16 %v182_v40, %v181_v39 }
  0x42   :  { %v84_v47 = vld [vmem:[#allocation5 + $0xa0] sm:$0xff]  ;;  %v386_v48 = vpack.c.bf16 %v200_v44, %v199_v43  ;;  %v184_v50 = vld [vmem:[#allocation7 + $0x28] sm:$0xff]  ;;  %v366_v51 = vpack.c.bf16 %v87_v41, %v85_v31  ;;  %v86_v52 = vld [vmem:[#allocation5 + $0xb0] sm:$0xff] }
  0x43   :  { %357 = vmatpush1.bf16.msra.mxu0 %v356_v20  ;;  %381 = vmatpush3.bf16.msra.mxu1 %v380_v37  ;;  %v183_v49 = vld [vmem:[#allocation7 + $0x20] sm:$0xff]  ;;  %v201_v53 = vld [vmem:[#allocation7 + $0xb0] sm:$0xff]  ;;  %v202_v54 = vld [vmem:[#allocation7 + $0xb8] sm:$0xff]  ;;  %v368_v58 = vpack.c.bf16 %v86_v52, %v84_v47 }
  0x44   :  { %359 = vmatprep.subr.bf16.mxu0 %v358_v21  ;;  %383 = vmatprep.subr.bf16.mxu1 %v382_v42  ;;  %v89_v55 = vld [vmem:[#allocation5 + $0xc8] sm:$0xff]  ;;  %v91_v56 = vld [vmem:[#allocation5 + $0xd8] sm:$0xff]  ;;  %v388_v57 = vpack.c.bf16 %v184_v50, %v183_v49  ;;  %v88_v59 = vld [vmem:[#allocation5 + $0xc0] sm:$0xff]  ;;  %v390_v60 = vpack.c.bf16 %v202_v54, %v201_v53 }
  0x45   :  { %v185_v61 = vld [vmem:[#allocation7 + $0x30] sm:$0xff]  ;;  %v186_v62 = vld [vmem:[#allocation7 + $0x38] sm:$0xff]  ;;  %v370_v63 = vpack.c.bf16 %v91_v56, %v89_v55  ;;  %v203_v2 = vld [vmem:[#allocation7 + $0xc0] sm:$0xff] }
  0x46   :  { %v90_v1 = vld [vmem:[#allocation5 + $0xd0] sm:$0xff]  ;;  %v204_v3 = vld [vmem:[#allocation7 + $0xc8] sm:$0xff]  ;;  %v95_v5 = vld [vmem:[#allocation5 + $0xf8] sm:$0xff]  ;;  %v392_v6 = vpack.c.bf16 %v186_v62, %v185_v61 }
  0x47   :  { %361 = vmatpush1.bf16.msra.mxu0 %v360_v30  ;;  %385 = vmatpush3.bf16.msra.mxu1 %v384_v45  ;;  %v93_v4 = vld [vmem:[#allocation5 + $0xe8] sm:$0xff]  ;;  %v372_v7 = vpack.c.bf16 %v90_v1, %v88_v59  ;;  %v92_v8 = vld [vmem:[#allocation5 + $0xe0] sm:$0xff]  ;;  %v394_v9 = vpack.c.bf16 %v204_v3, %v203_v2  ;;  %v94_v13 = vld [vmem:[#allocation5 + $0xf0] sm:$0xff] }
  0x48   :  { %363 = vmatprep.subr.bf16.mxu0 %v362_v36  ;;  %387 = vmatprep.subr.bf16.mxu1 %v386_v48  ;;  %v187_v10 = vld [vmem:[#allocation7 + $0x40] sm:$0xff]  ;;  %v188_v11 = vld [vmem:[#allocation7 + $0x48] sm:$0xff]  ;;  %v374_v12 = vpack.c.bf16 %v95_v5, %v93_v4  ;;  %v205_v14 = vld [vmem:[#allocation7 + $0xd0] sm:$0xff]  ;;  %v376_v17 = vpack.c.bf16 %v94_v13, %v92_v8 }
  0x49   :  { %v206_v15 = vld [vmem:[#allocation7 + $0xd8] sm:$0xff]  ;;  %v396_v16 = vpack.c.bf16 %v188_v11, %v187_v10  ;;  %v189_v19 = vld [vmem:[#allocation7 + $0x50] sm:$0xff]  ;;  %v207_v21 = vld [vmem:[#allocation7 + $0xe0] sm:$0xff] }
  0x4a   :  { %v398_v18 = vpack.c.bf16 %v206_v15, %v205_v14  ;;  %v190_v20 = vld [vmem:[#allocation7 + $0x58] sm:$0xff]  ;;  %v208_v22 = vld [vmem:[#allocation7 + $0xe8] sm:$0xff]  ;;  %v62_v24 = vld [vmem:[#allocation2] sm:$0xff] }
  0x4b   :  { %365 = vmatpush1.bf16.msra.mxu0 %v364_v46  ;;  %389 = vmatpush3.bf16.msra.mxu1 %v388_v57  ;;  %v400_v23 = vpack.c.bf16 %v190_v20, %v189_v19  ;;  %v402_v25 = vpack.c.bf16 %v208_v22, %v207_v21  ;;  %v191_v26 = vld [vmem:[#allocation7 + $0x60] sm:$0xff]  ;;  %v192_v27 = vld [vmem:[#allocation7 + $0x68] sm:$0xff]  ;;  %v63_v29 = vld [vmem:[#allocation2 + $0x8] sm:$0xff] }
  0x4c   :  { %367 = vmatprep.subr.bf16.mxu0 %v366_v51  ;;  %391 = vmatprep.subr.bf16.mxu1 %v390_v60  ;;  %v404_v28 = vpack.c.bf16 %v192_v27, %v191_v26  ;;  %v209_v30 = vld [vmem:[#allocation7 + $0xf0] sm:$0xff]  ;;  %v210_v31 = vld [vmem:[#allocation7 + $0xf8] sm:$0xff] }
  0x4d   :  { %v406_v32 = vpack.c.bf16 %v210_v31, %v209_v30  ;;  %v193_v33 = vld [vmem:[#allocation7 + $0x70] sm:$0xff]  ;;  %v194_v34 = vld [vmem:[#allocation7 + $0x78] sm:$0xff] }
  0x4e   :  { %v408_v35 = vpack.c.bf16 %v194_v34, %v193_v33 }
  0x4f   :  { %369 = vmatpush1.bf16.msra.mxu0 %v368_v58  ;;  %393 = vmatpush3.bf16.msra.mxu1 %v392_v6 }
  0x50   :  { %371 = vmatprep.subr.bf16.mxu0 %v370_v63  ;;  %395 = vmatprep.subr.bf16.mxu1 %v394_v9 }
  0x53   :  { %373 = vmatpush1.bf16.msra.mxu0 %v372_v7  ;;  %397 = vmatpush3.bf16.msra.mxu1 %v396_v16 }
  0x54   :  { %375 = vmatprep.subr.bf16.mxu0 %v374_v12  ;;  %399 = vmatprep.subr.bf16.mxu1 %v398_v18 }
  0x57   :  { %377 = vmatpush1.bf16.msra.mxu0 %v376_v17  ;;  %401 = vmatpush3.bf16.msra.mxu1 %v400_v23 }
  0x58   :  { %403 = vmatprep.subr.bf16.mxu1 %v402_v25 }
  0x5a   :  { %161 = vmatmul.mubr.f32.vlgmr.msra.gmra.mrb[0].mxu0 %v62_v24 }
  0x5b   :  { %166 = vmatprep.mubr.f32.mxu0 %v520_v0  ;;  %405 = vmatpush3.bf16.msra.mxu1 %v404_v28 }
  0x5c   :  { %407 = vmatprep.subr.bf16.mxu1 %v406_v32 }
  0x5e   :  { %167 = vmatmul.mubr.f32.gmra.mrb[2].mxu0 %v63_v29 }
  0x5f   :  { %409 = vmatpush3.bf16.msra.mxu1 %v408_v35 }
 0x12d   :  { %v162_v36 = vpop.f32.mrb[0].mxu0 }
 0x12e   :  { %v164_v37 = vpop.f32.mrb[1].mxu0  ;;  %v173_v39 = vmax.f32 %v162_v36, 0.0 }
 0x12f   :  { %v174_v38 = vmax.f32 %v164_v37, 0.0 }
 0x131   :  { %v168_v40 = vpop.f32.mrb[2].mxu0  ;;  %275 = vmatprep.mubr.f32.mxu1 %v174_v38 }
 0x132   :  { %v170_v41 = vpop.f32.mrb[3].mxu0  ;;  %276 = vmatmul.mubr.f32.vlgmr.msra.gmra.mrb[0].mxu1 %v173_v39  ;;  %v175_v42 = vmax.f32 %v168_v40, 0.0 }
 0x133   :  { %v176_v0 = vmax.f32 %v170_v41, 0.0 }
 0x135   :  { %280 = vmatprep.mubr.f32.mxu1 %v176_v0 }
 0x136   :  { %281 = vmatmul.mubr.f32.gmra.mrb[2].mxu1 %v175_v42 }
 0x205   :  { %v340_v43 = vpop.f32.mrb[0].mxu1 }
 0x206   :  { %v341_v44 = vpop.f32.mrb[1].mxu1 }
 0x207   :  { %v342_v45 = vadd.f32 %v341_v44, %v340_v43 }
 0x209   :  { %v343_v46 = vpop.f32.mrb[2].mxu1  ;;  %288 = vst [vmem:[#allocation8] sm:$0xff] %v342_v45 }
 0x20a   :  { %v344_v47 = vpop.f32.mrb[3].mxu1 }
 0x20b   :  { %v345_v48 = vadd.f32 %v344_v47, %v343_v46 }
 0x20d   :  { %289 = vst [vmem:[#allocation8 + $0x8] sm:$0xff] %v345_v48 }
 0x20e   :  { %496 = shalt.err (!%p493_p0)
}
 0x20f   :  { %s497_s27 = scalar_lea.hbm %s604_s3, 256 }
 0x210   :  { %p498_p1 = scmp.ne.s32.totalorder %s604_s3, %s497_s27  ;;  %p501_p2 = scmp.lt.u32.totalorder %s497_s27, %s604_s3 }
 0x212   :  { %p503_p3 = pnand %p501_p2, %p498_p1 }
 0x214   :  { %506 = shalt.err (!%p503_p3)
}
 0x215   :  { %301 = dma.vmem_to_hbm [thread:$0]  %s296_s23, 256, %s604_s3, [#allocation4], %s517_s1, %s517_s1, %s518_s9  }
 0x216   :  { %511 = dma.done.wait [#allocation4], 256  }
 0x217   :  { %512 = vsyncadd [#allocation4], 4294967040 }
 0x218   :  { %305 = vsyncpa [#allocation3], 1 }
 0x219   :  { %306 = vsyncpa [#allocation6], 1 }
 0x21a   :  { %307 = vsyncpa [#allocation4], 1 }

</bundles_post_ra>
